<compile_context>
chip_gen: v6e
topology: v6e:2x2x1
jax: 0.10.0
libtpu: 0.0.40
codegen_flags: <defaults>
</compile_context>

<pallas_src>
import functools

import jax
import jax.numpy as jnp
from jax.experimental import pallas as pl
from jax.experimental.pallas import tpu as pltpu


def _round_up(n: int, m: int) -> int:
    return ((n + m - 1) // m) * m


def _pick_tile_m(n_tokens: int, tile_m: int):
    """Pick token-tile size TM and padded token count Np.

    Prefers a multiple-of-16 divisor of N (no N-pad pass, no output slice) and
    caps TM so the token grid has >= ~8 steps when N is large enough (keeps the
    DMA/compute pipeline busy and lets v7x shard token tiles across its 2 TCs).
    """
    if n_tokens <= 16:
        return n_tokens, n_tokens                 # single full-extent tile
    cap = min(tile_m, n_tokens)
    cap = max(16, min(cap, _round_up(pl.cdiv(n_tokens, 8), 16)))
    tm = (cap // 16) * 16
    while tm >= 16:
        if n_tokens % tm == 0:
            return tm, n_tokens                   # exact divisor -> no padding
        tm -= 16
    tm = (cap // 16) * 16
    return tm, _round_up(n_tokens, tm)            # fall back: pad the tail tile


def _pick_tile_n(d_pad: int, k_pad: int, weight_budget_bytes: int):
    """Column-tile size TN for the (K, D) weight.

    The weight stays VMEM-resident (single-buffered); if it would exceed the
    budget (matters on v7x's 64 MiB VMEM with large d_model), tile the D axis so
    only a (K, TN) slab is resident per grid step.
    """
    if k_pad * d_pad * 2 <= weight_budget_bytes:
        return d_pad
    tn = max(128, (weight_budget_bytes // (k_pad * 2)) // 128 * 128)
    while d_pad % tn != 0:                        # d_pad is a multiple of 128,
        tn -= 128                                 # so this terminates at >= 128
    return tn


def _patch_embed_kernel(x_ref, w_ref, b_ref, o_ref):
    # x_ref: (TM, Kp) bf16 token tile, w_ref: (Kp, TN) bf16 weight slab,
    # b_ref: (1, TN) f32 bias, o_ref: (TM, TN) out_dtype.
    # MXU matmul with f32 accumulate; bias add in f32; single cast on store.
    acc = jnp.dot(x_ref[...], w_ref[...], preferred_element_type=jnp.float32)
    o_ref[...] = (acc + b_ref[...]).astype(o_ref.dtype)


def token_embedding(x, weight, bias, *, spatial_patch_size, temporal_patch_size,
                    tile_m=512, out_dtype=None,
                    weight_budget_bytes=16 * 1024 * 1024):
    """
    x:      (B, C, F, H, W)              float32 (NCDHW, PyTorch convention)
    weight: (d_model, C, Tp, Sp, Sp)     PyTorch Conv3d weight layout
    bias:   (d_model,)
    returns (B, F // Tp, (H // Sp) * (W // Sp), d_model)  in out_dtype
            (out_dtype=None -> x.dtype, matching the PyTorch module; bf16 is the
             fast path: halves the dominant HBM writeback of this mem-bound op)
    """
    B, C, F, H, W = x.shape
    d_model = weight.shape[0]
    Tp, Sp = temporal_patch_size, spatial_patch_size
    Ft, Hp, Wp = F // Tp, H // Sp, W // Sp
    K = C * Tp * Sp * Sp
    N = B * Ft * Hp * Wp
    out_dtype = x.dtype if out_dtype is None else out_dtype
    out_itemsize = jnp.dtype(out_dtype).itemsize

    # --- tiling / padding geometry -------------------------------------------
    Kp = _round_up(K, 128)          # lane quantum only (kernel is HBM-bound;
                                    # full 256-wide MXU passes are irrelevant)
    Dp = _round_up(d_model, 128)    # lane-dense (unmasked) output stores
    TM, Np = _pick_tile_m(N, tile_m)
    TN = _pick_tile_n(Dp, Kp, weight_budget_bytes)
    gm, gd = Np // TM, Dp // TN

    # --- glue: extract non-overlapping (Tp, Sp, Sp) patches -------------------
    # Flattening order (C, Tp, Sp, Sp) matches the Conv3d weight layout.  Under
    # jit, transpose + bf16 cast + zero-pad fuse into one pass, so the token
    # buffer is materialized exactly once in HBM.
    xp = x.reshape(B, C, Ft, Tp, Hp, Sp, Wp, Sp)
    xp = xp.transpose(0, 2, 4, 6, 1, 3, 5, 7)     # (B, Ft, Hp, Wp, C, Tp, Sp, Sp)
    tokens = xp.reshape(N, K).astype(jnp.bfloat16)
    if (Np != N) or (Kp != K):
        tokens = jnp.pad(tokens, ((0, Np - N), (0, Kp - K)))

    w_mat = weight.reshape(d_model, K).T.astype(jnp.bfloat16)    # (K, d_model)
    if (Kp != K) or (Dp != d_model):
        w_mat = jnp.pad(w_mat, ((0, Kp - K), (0, Dp - d_model)))
    b_row = bias.reshape(1, d_model).astype(jnp.float32)
    if Dp != d_model:
        b_row = jnp.pad(b_row, ((0, 0), (0, Dp - d_model)))

    # --- VMEM budget: tokens & output double-buffered, weight single-buffered -
    vmem_bytes = (2 * TM * Kp * 2                # token tiles (bf16, 2 buffers)
                  + Kp * TN * 2                  # weight slab (bf16, 1 buffer)
                  + 2 * TN * 4                   # bias row
                  + 2 * TM * TN * out_itemsize)  # output tiles (2 buffers)
    vmem_limit = int(min(max(vmem_bytes * 5 // 4, 32 << 20), 120 << 20))

    cost = pl.CostEstimate(
        flops=2 * Np * Kp * Dp,
        transcendentals=0,
        bytes_accessed=(gd * Np * Kp * 2 + Kp * Dp * 2 + Dp * 4
                        + Np * Dp * out_itemsize),
    )

    out_flat = pl.pallas_call(
        _patch_embed_kernel,
        out_shape=jax.ShapeDtypeStruct((Np, Dp), out_dtype),
        grid_spec=pltpu.PrefetchScalarGridSpec(
            num_scalar_prefetch=0,
            # Token axis innermost: the resident weight slab stays put while
            # token tiles stream through the double-buffered pipeline.
            grid=(gd, gm),
            in_specs=[
                pl.BlockSpec((TM, Kp), lambda j, i: (i, 0)),
                pl.BlockSpec((Kp, TN), lambda j, i: (0, j),
                             pipeline_mode=pl.Buffered(1)),   # resident, 1 buffer
                pl.BlockSpec((1, TN), lambda j, i: (0, j),
                             pipeline_mode=pl.Buffered(1)),
            ],
            out_specs=pl.BlockSpec((TM, TN), lambda j, i: (i, j)),
        ),
        compiler_params=pltpu.CompilerParams(
            dimension_semantics=("arbitrary", "parallel"),  # 2 TCs on v7x
            vmem_limit_bytes=vmem_limit,
        ),
        cost_estimate=cost,
    )(tokens, w_mat, b_row)

    out = out_flat
    if (Np != N) or (Dp != d_model):                # skip slice pass if no pad
        out = out_flat[:N, :d_model]
    return out.reshape(B, Ft, Hp * Wp, d_model)


if __name__ == "__main__":
    # Small, forward-consistent shapes.
    B, C, F = 2, 3, 2
    img_size = 16
    Sp, Tp = 8, 1
    d_model = 32

    key = jax.random.PRNGKey(0)
    kx, kw, kb = jax.random.split(key, 3)

    x = jax.random.normal(kx, (B, C, F, img_size, img_size), dtype=jnp.float32)

    # Deterministic Conv3d parameter init (PyTorch-like uniform scale).
    fan_in = C * Tp * Sp * Sp
    bound = 1.0 / (fan_in ** 0.5)
    weight = jax.random.uniform(
        kw, (d_model, C, Tp, Sp, Sp), minval=-bound, maxval=bound,
        dtype=jnp.float32)
    bias = jax.random.uniform(
        kb, (d_model,), minval=-bound, maxval=bound, dtype=jnp.float32)

    # Module-semantics path (f32 output, as the PyTorch Conv3d forward).
    fn = jax.jit(functools.partial(
        token_embedding, spatial_patch_size=Sp, temporal_patch_size=Tp))
    out = jax.block_until_ready(fn(x, weight, bias))

    # Reference in plain JAX f32 (patch GEMM == Conv3d with stride == kernel).
    xp = x.reshape(B, C, F // Tp, Tp, img_size // Sp, Sp, img_size // Sp, Sp)
    xp = xp.transpose(0, 2, 4, 6, 1, 3, 5, 7).reshape(-1, fan_in)
    ref = (xp @ weight.reshape(d_model, fan_in).T + bias).reshape(
        B, F // Tp, (img_size // Sp) ** 2, d_model)

    assert out.shape == (B, F // Tp, (img_size // Sp) ** 2, d_model)
    assert out.dtype == x.dtype
    # bf16 matmul operands (f32 accumulate) -> loosened tolerance vs f32 ref.
    assert jnp.allclose(out, ref, atol=2e-2, rtol=2e-2)

    # Performance path: bf16 output halves the dominant HBM writeback.
    fn_bf16 = jax.jit(functools.partial(
        token_embedding, spatial_patch_size=Sp, temporal_patch_size=Tp,
        out_dtype=jnp.bfloat16))
    out_bf16 = jax.block_until_ready(fn_bf16(x, weight, bias))
    assert out_bf16.dtype == jnp.bfloat16
    assert jnp.allclose(out_bf16.astype(jnp.float32), ref, atol=5e-2, rtol=5e-2)

    print("KERNEL_OK")
</pallas_src>

<mosaic_0001>
module attributes {stable_mosaic.version = 11 : i64} {
  func.func @_patch_embed_kernel(%arg0: i32, %arg1: i32, %arg2: memref<16x256xbf16, #tpu.memory_space<vmem>>, %arg3: memref<256x128xbf16, #tpu.memory_space<vmem>>, %arg4: memref<1x128xf32, #tpu.memory_space<vmem>>, %arg5: memref<16x128xf32, #tpu.memory_space<vmem>>) attributes {dimension_semantics = [#tpu.dimension_semantics<arbitrary>, #tpu.dimension_semantics<parallel>], iteration_bounds = array<i64: 1, 1>, scalar_prefetch = 0 : i64, scratch_operands = 0 : i64, tpu.core_type = #tpu.core_type<tc>, window_params = [{transform_indices = @transform_0, window_bounds = array<i64: 16, 256>}, {pipeline_mode = #tpu.pipeline_mode<synchronous>, transform_indices = @transform_1, window_bounds = array<i64: 256, 128>}, {pipeline_mode = #tpu.pipeline_mode<synchronous>, transform_indices = @transform_2, window_bounds = array<i64: 1, 128>}, {transform_indices = @transform_3, window_bounds = array<i64: 16, 128>}]} {
    %c0 = arith.constant 0 : index
    %c0_0 = arith.constant 0 : index
    %0 = vector.load %arg2[%c0, %c0_0] : memref<16x256xbf16, #tpu.memory_space<vmem>>, vector<16x256xbf16>
    %c0_1 = arith.constant 0 : index
    %c0_2 = arith.constant 0 : index
    %1 = vector.load %arg3[%c0_1, %c0_2] : memref<256x128xbf16, #tpu.memory_space<vmem>>, vector<256x128xbf16>
    %cst = arith.constant dense<0.000000e+00> : vector<16x128xf32>
    %2 = tpu.matmul %0, %1, %cst {dimension_numbers = #tpu.dot_dimension_numbers<[1], [0], [0], [1], [0, 0, 1, 1], [], []>} : vector<16x256xbf16>, vector<256x128xbf16>, vector<16x128xf32> -> vector<16x128xf32>
    %c0_3 = arith.constant 0 : index
    %c0_4 = arith.constant 0 : index
    %3 = vector.load %arg4[%c0_3, %c0_4] : memref<1x128xf32, #tpu.memory_space<vmem>>, vector<1x128xf32>
    %4 = vector.broadcast %3 : vector<1x128xf32> to vector<16x128xf32>
    %5 = arith.addf %2, %4 : vector<16x128xf32>
    %c0_5 = arith.constant 0 : index
    %c0_6 = arith.constant 0 : index
    %6 = vector.load %arg5[%c0_5, %c0_6] : memref<16x128xf32, #tpu.memory_space<vmem>>, vector<16x128xf32>
    tpu.vector_store %arg5[%c0_5, %c0_6], %5 {strides = array<i32>} : memref<16x128xf32, #tpu.memory_space<vmem>>, vector<16x128xf32>,
    return
  }
  func.func @transform_0(%arg0: i32, %arg1: i32) -> (i32, i32) {
    %c0_i32 = arith.constant 0 : i32
    %c0_i32_0 = arith.constant 0 : i32
    return %arg1, %c0_i32 : i32, i32
  }
  func.func @transform_1(%arg0: i32, %arg1: i32) -> (i32, i32) {
    %c0_i32 = arith.constant 0 : i32
    %c0_i32_0 = arith.constant 0 : i32
    return %c0_i32, %arg0 : i32, i32
  }
  func.func @transform_2(%arg0: i32, %arg1: i32) -> (i32, i32) {
    %c0_i32 = arith.constant 0 : i32
    %c0_i32_0 = arith.constant 0 : i32
    return %c0_i32, %arg0 : i32, i32
  }
  func.func @transform_3(%arg0: i32, %arg1: i32) -> (i32, i32) {
    %c0_i32 = arith.constant 0 : i32
    return %arg1, %arg0 : i32, i32
  }
}

</mosaic_0001>

<bundles_post_ra>
// kernel: token_embedding.1
= control target key start
LH: loop header
LB: loop body
LE: loop exit
PB: predicated region body
PF: predicated region fallthrough
CT: control target
= control target key end

     0   :  { %s390_s0 = inlined_call_operand.vmem [shape: bf16[16,256], index: 0, kind: input, shape index: {}]   ;;  %s391_s1 = inlined_call_operand.vmem [shape: bf16[256,128], index: 1, kind: input, shape index: {}]   ;;  %s392_s2 = inlined_call_operand.vmem [shape: f32[1,128], index: 2, kind: input, shape index: {}]   ;;  %s393_s3 = inlined_call_operand.hbm [shape: f32[16,128], index: 3, kind: output, shape index: {}]  }
   0x1   :  { %v266_v0 = vld [vmem:[%s391_s1 + $0x78] sm:$0xff]   ;;  %v268_v2 = vld [vmem:[%s391_s1 + $0x70] sm:$0xff]   ;;  %v270_v4 = vld [vmem:[%s391_s1 + $0x68] sm:$0xff]  }
   0x2   :  { %v267_v1 = vld [vmem:[%s391_s1 + $0x38] sm:$0xff]   ;;  %241 = vmatprep.subr.bf16.mxu0 %v266_v0  ;;  %v269_v3 = vld [vmem:[%s391_s1 + $0x30] sm:$0xff]   ;;  %v271_v5 = vld [vmem:[%s391_s1 + $0x28] sm:$0xff]  }
   0x3   :  { %242 = vmatpush3.bf16.msra.mxu0 %v267_v1  ;;  %v272_v6 = vld [vmem:[%s391_s1 + $0x60] sm:$0xff]   ;;  %v274_v8 = vld [vmem:[%s391_s1 + $0x58] sm:$0xff]   ;;  %v276_v10 = vld [vmem:[%s391_s1 + $0x50] sm:$0xff]  }
   0x4   :  { %243 = vmatprep.subr.bf16.mxu0 %v268_v2  ;;  %v273_v7 = vld [vmem:[%s391_s1 + $0x20] sm:$0xff]   ;;  %v275_v9 = vld [vmem:[%s391_s1 + $0x18] sm:$0xff]  }
   0x5   :  { %v284_v11 = vld [vmem:[%s390_s0 + $0x4] ss:$8 sps:$4 sm:$0xff]  }
   0x7   :  { %244 = vmatpush3.bf16.msra.mxu0 %v269_v3 }
   0x8   :  { %245 = vmatprep.subr.bf16.mxu0 %v270_v4 }
   0xb   :  { %246 = vmatpush3.bf16.msra.mxu0 %v271_v5 }
   0xc   :  { %247 = vmatprep.subr.bf16.mxu0 %v272_v6 }
   0xf   :  { %248 = vmatpush3.bf16.msra.mxu0 %v273_v7 }
  0x10   :  { %249 = vmatprep.subr.bf16.mxu0 %v274_v8 }
  0x11   :  { %8 = vsyncpa [#allocation3], 0  ;;  %v277_v12 = vld [vmem:[%s391_s1 + $0x10] sm:$0xff]   ;;  %195 = vmatprep.mubr.bf16.mxu0 %v284_v11  ;;  %v278_v13 = vld [vmem:[%s391_s1 + $0x48] sm:$0xff]   ;;  %s307_s23 = smov [#allocation2]  }
  0x12   :  { %v279_v14 = vld [vmem:[%s391_s1 + $0x8] sm:$0xff]   ;;  %v280_v15 = vld [vmem:[%s391_s1 + $0x40] sm:$0xff]   ;;  %s211_s24 = sshll.u32 %s307_s23, 4  ;;  %s212_s24 = int_to_ptr.vmem [resolvable:$true] %s211_s24 }
  0x13   :  { %250 = vmatpush3.bf16.msra.mxu0 %v275_v9  ;;  %v281_v16 = vld [vmem:[%s391_s1] sm:$0xff]   ;;  %p290_p1 = scmp.lt.s32.totalorder %s212_s24, %s212_s24 }
  0x14   :  { %251 = vmatprep.subr.bf16.mxu0 %v276_v10  ;;  %v282_v17 = vld [vmem:[%s390_s0] ss:$8 sps:$4 sm:$0xff]   ;;  %s285_s0 = scalar_lea.vmem %s212_s24, 256 }
  0x15   :  { %v222_v19 = vld [vmem:[%s392_s2] ss:$0 sm:$0xff]  ;;  %p286_p0 = scmp.ne.s32.totalorder %s212_s24, %s285_s0  ;;  %p291_p2 = scmp.lt.s32.totalorder %s285_s0, %s285_s0 }
  0x17   :  { %252 = vmatpush3.bf16.msra.mxu0 %v277_v12  ;;  %p292_p3 = por %p291_p2, %p290_p1 }
  0x18   :  { %253 = vmatprep.subr.bf16.mxu0 %v278_v13 }
  0x19   :  { %p293_p4 = pnand %p292_p3, %p286_p0 }
  0x1b   :  { %254 = vmatpush3.bf16.msra.mxu0 %v279_v14 }
  0x1c   :  { %255 = vmatprep.subr.bf16.mxu0 %v280_v15 }
  0x1f   :  { %256 = vmatpush3.bf16.msra.mxu0 %v281_v16 }
  0x22   :  { %196 = vmatmul.mubr.bf16.vlgmr.msra.gmra.mxu0 %v282_v17 }
  0xe2   :  { %v257_v18 = vpop.f32.mrf.mxu0 }
  0xe4   :  { %v258_v20 = vpop.f32.mrf.mxu0 }
  0xe5   :  { %v259_v21 = vadd.f32 %v258_v20, %v257_v18 }
  0xe6   :  { %v260_v22 = vpop.f32.mrf.mxu0 }
  0xe7   :  { %v198_v23 = vadd.f32 %v259_v21, %v222_v19 }
  0xe8   :  { %v261_v24 = vpop.f32.mrf.mxu0 }
  0xe9   :  { %204 = vst [vmem:[#allocation2] sm:$0xff] %v198_v23  ;;  %v262_v25 = vadd.f32 %v261_v24, %v260_v22 }
  0xeb   :  { %v201_v26 = vadd.f32 %v262_v25, %v222_v19 }
  0xed   :  { %205 = vst [vmem:[#allocation2 + $0x8] sm:$0xff] %v201_v26 }
  0xee   :  { %296 = shalt.err (!%p293_p4)
}
  0xef   :  { %s308_s1 = smov 128   ;;  %s309_s2 = smov 8  }
  0xf0   :  { %217 = dma.vmem_to_hbm [thread:$0]  %s212_s24, 256, %s393_s3, [#allocation3], %s308_s1, %s308_s1, %s309_s2  }
  0xf1   :  { %305 = dma.done.wait [#allocation3], 256  }
  0xf2   :  { %306 = vsyncadd [#allocation3], 4294967040 }
  0xf3   :  { %221 = vsyncpa [#allocation3], 1 }

</bundles_post_ra>
